<compile_context>
chip_gen: v7x
topology: tpu7x:2x2x1
jax: 0.10.0
libtpu: 0.0.40
codegen_flags: <defaults>
</compile_context>

<pallas_src>
import jax
import jax.numpy as jnp
from jax import lax
from jax.experimental import pallas as pl
from jax.experimental.pallas import tpu as pltpu

TEXT_DIM = 300
H_DIM = 50
BN_EPS = 1e-5

# Default batch tile. Multiple of 8 (sublane); ~512-2048 rows keeps the
# pipelined DMA efficient while the per-TC VMEM footprint stays tiny
# (TB=512 -> ~0.8 MiB for the x tile, fine even for v5e's 16 MiB default
# scoped VMEM and v7x's 64 MiB physical VMEM).
DEFAULT_TB = 512


def _round_up(n, m):
    return ((n + m - 1) // m) * m


def _text_encoder_kernel(x_ref, w1_ref, b1_ref, w2_ref, b2_ref, o_ref):
    # FC_Block 1: (folded Linear+BN) + ReLU  (+ Dropout = identity)
    h = jnp.dot(x_ref[...], w1_ref[...],
                preferred_element_type=jnp.float32) + b1_ref[...]
    h = jnp.maximum(h, 0.0)

    # FC_Block 2: (folded Linear+BN) + ReLU  (+ Dropout = identity)
    y = jnp.dot(h, w2_ref[...],
                preferred_element_type=jnp.float32) + b2_ref[...]
    o_ref[...] = jnp.maximum(y, 0.0)


def text_encoder_forward(x, params, *, tb=DEFAULT_TB):
    """x: (B, TEXT_DIM) float32. params: dict of layer parameters."""
    B, text_dim = x.shape
    h_dim = params["w1"].shape[1]
    out_dim = params["w2"].shape[1]

    # ---- Fold eval-mode BatchNorm into the linear layers (trace time) ----
    s1 = params["g1"] * lax.rsqrt(params["v1"] + BN_EPS)          # (1, h_dim)
    w1 = params["w1"] * s1                                        # (text_dim, h_dim)
    b1 = (params["b1"] - params["m1"]) * s1 + params["beta1"]     # (1, h_dim)

    s2 = params["g2"] * lax.rsqrt(params["v2"] + BN_EPS)          # (1, out_dim)
    w2 = params["w2"] * s2                                        # (h_dim, out_dim)
    b2 = (params["b2"] - params["m2"]) * s2 + params["beta2"]     # (1, out_dim)

    # ---- Batch tiling (pad B up to a multiple of the tile) ----
    tb = min(tb, _round_up(B, 8))
    Bp = _round_up(B, tb)
    if Bp != B:
        x = jnp.pad(x, ((0, Bp - B), (0, 0)))
    grid = (Bp // tb,)

    out = pl.pallas_call(
        _text_encoder_kernel,
        out_shape=jax.ShapeDtypeStruct((Bp, out_dim), jnp.float32),
        grid=grid,
        in_specs=[
            # Streaming batch tile of x.
            pl.BlockSpec((tb, text_dim), lambda i: (i, 0)),
            # Folded weights/biases: constant index_map -> stay VMEM-resident.
            pl.BlockSpec((text_dim, h_dim), lambda i: (0, 0)),
            pl.BlockSpec((1, h_dim), lambda i: (0, 0)),
            pl.BlockSpec((h_dim, out_dim), lambda i: (0, 0)),
            pl.BlockSpec((1, out_dim), lambda i: (0, 0)),
        ],
        out_specs=pl.BlockSpec((tb, out_dim), lambda i: (i, 0)),
        compiler_params=pltpu.CompilerParams(
            dimension_semantics=("parallel",)),
    )(x, w1, b1, w2, b2)

    return out[:B]


def init_params(key, text_dim=TEXT_DIM, h_dim=H_DIM, out_dim=32):
    """Deterministic synthetic parameter init (shapes follow the PyTorch __init__)."""
    ks = jax.random.split(key, 12)

    def lin_init(kw, kb, fan_in, fan_out):
        bound = 1.0 / jnp.sqrt(fan_in)
        # Stored as (in_dim, out_dim) == PyTorch weight.T
        w = jax.random.uniform(kw, (fan_in, fan_out), jnp.float32, -bound, bound)
        b = jax.random.uniform(kb, (1, fan_out), jnp.float32, -bound, bound)
        return w, b

    w1, b1 = lin_init(ks[0], ks[1], text_dim, h_dim)
    w2, b2 = lin_init(ks[2], ks[3], h_dim, out_dim)

    # BatchNorm1d params + running stats (deterministic, non-trivial values
    # so the normalization path is actually exercised).
    g1 = 1.0 + 0.1 * jax.random.normal(ks[4], (1, h_dim), jnp.float32)
    beta1 = 0.1 * jax.random.normal(ks[5], (1, h_dim), jnp.float32)
    m1 = 0.05 * jax.random.normal(ks[6], (1, h_dim), jnp.float32)
    v1 = 1.0 + 0.1 * jnp.abs(jax.random.normal(ks[7], (1, h_dim), jnp.float32))

    g2 = 1.0 + 0.1 * jax.random.normal(ks[8], (1, out_dim), jnp.float32)
    beta2 = 0.1 * jax.random.normal(ks[9], (1, out_dim), jnp.float32)
    m2 = 0.05 * jax.random.normal(ks[10], (1, out_dim), jnp.float32)
    v2 = 1.0 + 0.1 * jnp.abs(jax.random.normal(ks[11], (1, out_dim), jnp.float32))

    return {
        "w1": w1, "b1": b1, "g1": g1, "beta1": beta1, "m1": m1, "v1": v1,
        "w2": w2, "b2": b2, "g2": g2, "beta2": beta2, "m2": m2, "v2": v2,
    }


def _reference_forward(x, p):
    """Pure-JAX reference (eval-mode PyTorch semantics, un-folded BN)."""
    h = x @ p["w1"] + p["b1"]
    h = (h - p["m1"]) / jnp.sqrt(p["v1"] + BN_EPS) * p["g1"] + p["beta1"]
    h = jnp.maximum(h, 0.0)
    y = h @ p["w2"] + p["b2"]
    y = (y - p["m2"]) / jnp.sqrt(p["v2"] + BN_EPS) * p["g2"] + p["beta2"]
    return jnp.maximum(y, 0.0)


if __name__ == "__main__":
    key = jax.random.PRNGKey(0)
    k_x, k_p = jax.random.split(key)

    B, OUT_DIM = 8, 32
    x = jax.random.normal(k_x, (B, TEXT_DIM), jnp.float32)
    params = init_params(k_p, text_dim=TEXT_DIM, h_dim=H_DIM, out_dim=OUT_DIM)

    out = text_encoder_forward(x, params)
    out = jax.block_until_ready(out)

    ref = _reference_forward(x, params)
    assert out.shape == (B, OUT_DIM)
    assert jnp.allclose(out, ref, atol=1e-4, rtol=1e-4), "mismatch vs reference"

    # Also exercise a batch that needs padding / multiple grid steps.
    B2 = 1030
    x2 = jax.random.normal(k_x, (B2, TEXT_DIM), jnp.float32)
    out2 = jax.block_until_ready(text_encoder_forward(x2, params, tb=512))
    ref2 = _reference_forward(x2, params)
    assert out2.shape == (B2, OUT_DIM)
    assert jnp.allclose(out2, ref2, atol=1e-4, rtol=1e-4), "mismatch vs reference (tiled)"

    print("KERNEL_OK")
</pallas_src>

<mosaic_0001>
module attributes {stable_mosaic.version = 11 : i64} {
  func.func @_text_encoder_kernel(%arg0: i32, %arg1: memref<8x300xf32, #tpu.memory_space<vmem>>, %arg2: memref<300x50xf32, #tpu.memory_space<vmem>>, %arg3: memref<1x50xf32, #tpu.memory_space<vmem>>, %arg4: memref<50x32xf32, #tpu.memory_space<vmem>>, %arg5: memref<1x32xf32, #tpu.memory_space<vmem>>, %arg6: memref<8x32xf32, #tpu.memory_space<vmem>>) attributes {dimension_semantics = [#tpu.dimension_semantics<parallel>], iteration_bounds = array<i64: 1>, scalar_prefetch = 0 : i64, scratch_operands = 0 : i64, tpu.core_type = #tpu.core_type<tc>, window_params = [{transform_indices = @transform_0, window_bounds = array<i64: 8, 300>}, {pipeline_mode = #tpu.pipeline_mode<synchronous>, transform_indices = @transform_1, window_bounds = array<i64: 300, 50>}, {pipeline_mode = #tpu.pipeline_mode<synchronous>, transform_indices = @transform_2, window_bounds = array<i64: 1, 50>}, {pipeline_mode = #tpu.pipeline_mode<synchronous>, transform_indices = @transform_3, window_bounds = array<i64: 50, 32>}, {pipeline_mode = #tpu.pipeline_mode<synchronous>, transform_indices = @transform_4, window_bounds = array<i64: 1, 32>}, {transform_indices = @transform_5, window_bounds = array<i64: 8, 32>}]} {
    %c0 = arith.constant 0 : index
    %c0_0 = arith.constant 0 : index
    %0 = vector.load %arg1[%c0, %c0_0] : memref<8x300xf32, #tpu.memory_space<vmem>>, vector<8x300xf32>
    %c0_1 = arith.constant 0 : index
    %c0_2 = arith.constant 0 : index
    %1 = vector.load %arg2[%c0_1, %c0_2] : memref<300x50xf32, #tpu.memory_space<vmem>>, vector<300x50xf32>
    %cst = arith.constant dense<0.000000e+00> : vector<8x50xf32>
    %2 = tpu.matmul %0, %1, %cst {dimension_numbers = #tpu.dot_dimension_numbers<[1], [0], [0], [1], [0, 0, 1, 1], [], []>} : vector<8x300xf32>, vector<300x50xf32>, vector<8x50xf32> -> vector<8x50xf32>
    %c0_3 = arith.constant 0 : index
    %c0_4 = arith.constant 0 : index
    %3 = vector.load %arg3[%c0_3, %c0_4] : memref<1x50xf32, #tpu.memory_space<vmem>>, vector<1x50xf32>
    %4 = vector.broadcast %3 : vector<1x50xf32> to vector<8x50xf32>
    %5 = arith.addf %2, %4 : vector<8x50xf32>
    %cst_5 = arith.constant 0.000000e+00 : f32
    %6 = vector.broadcast %cst_5 : f32 to vector<8x50xf32>
    %7 = arith.maximumf %5, %6 : vector<8x50xf32>
    %c0_6 = arith.constant 0 : index
    %c0_7 = arith.constant 0 : index
    %8 = vector.load %arg4[%c0_6, %c0_7] : memref<50x32xf32, #tpu.memory_space<vmem>>, vector<50x32xf32>
    %cst_8 = arith.constant dense<0.000000e+00> : vector<8x32xf32>
    %9 = tpu.matmul %7, %8, %cst_8 {dimension_numbers = #tpu.dot_dimension_numbers<[1], [0], [0], [1], [0, 0, 1, 1], [], []>} : vector<8x50xf32>, vector<50x32xf32>, vector<8x32xf32> -> vector<8x32xf32>
    %c0_9 = arith.constant 0 : index
    %c0_10 = arith.constant 0 : index
    %10 = vector.load %arg5[%c0_9, %c0_10] : memref<1x32xf32, #tpu.memory_space<vmem>>, vector<1x32xf32>
    %11 = vector.broadcast %10 : vector<1x32xf32> to vector<8x32xf32>
    %12 = arith.addf %9, %11 : vector<8x32xf32>
    %cst_11 = arith.constant 0.000000e+00 : f32
    %13 = vector.broadcast %cst_11 : f32 to vector<8x32xf32>
    %14 = arith.maximumf %12, %13 : vector<8x32xf32>
    %c0_12 = arith.constant 0 : index
    %c0_13 = arith.constant 0 : index
    %15 = vector.load %arg6[%c0_12, %c0_13] : memref<8x32xf32, #tpu.memory_space<vmem>>, vector<8x32xf32>
    tpu.vector_store %arg6[%c0_12, %c0_13], %14 {strides = array<i32>} : memref<8x32xf32, #tpu.memory_space<vmem>>, vector<8x32xf32>,
    return
  }
  func.func @transform_0(%arg0: i32) -> (i32, i32) {
    %c0_i32 = arith.constant 0 : i32
    %c0_i32_0 = arith.constant 0 : i32
    return %arg0, %c0_i32 : i32, i32
  }
  func.func @transform_1(%arg0: i32) -> (i32, i32) {
    %c0_i32 = arith.constant 0 : i32
    %c0_i32_0 = arith.constant 0 : i32
    %c0_i32_1 = arith.constant 0 : i32
    return %c0_i32, %c0_i32_0 : i32, i32
  }
  func.func @transform_2(%arg0: i32) -> (i32, i32) {
    %c0_i32 = arith.constant 0 : i32
    %c0_i32_0 = arith.constant 0 : i32
    %c0_i32_1 = arith.constant 0 : i32
    return %c0_i32, %c0_i32_0 : i32, i32
  }
  func.func @transform_3(%arg0: i32) -> (i32, i32) {
    %c0_i32 = arith.constant 0 : i32
    %c0_i32_0 = arith.constant 0 : i32
    %c0_i32_1 = arith.constant 0 : i32
    return %c0_i32, %c0_i32_0 : i32, i32
  }
  func.func @transform_4(%arg0: i32) -> (i32, i32) {
    %c0_i32 = arith.constant 0 : i32
    %c0_i32_0 = arith.constant 0 : i32
    %c0_i32_1 = arith.constant 0 : i32
    return %c0_i32, %c0_i32_0 : i32, i32
  }
  func.func @transform_5(%arg0: i32) -> (i32, i32) {
    %c0_i32 = arith.constant 0 : i32
    %c0_i32_0 = arith.constant 0 : i32
    return %arg0, %c0_i32 : i32, i32
  }
}

</mosaic_0001>

<bundles_post_ra>
// kernel: tpu_custom_call.1
= control target key start
LH: loop header
LB: loop body
LE: loop exit
PB: predicated region body
PF: predicated region fallthrough
CT: control target
= control target key end

     0   :  { %v495_v7 = vmov 0.0|0.0   ;;  %vm496_vm0 = vmmov 0   ;;  %v497_v13 = vmov 0.0   ;;  %vm73_vm1 = vcmask 1043456   ;;  %s703_s0 = inlined_call_operand.vmem [shape: f32[8,300], index: 0, kind: input, shape index: {}]   ;;  %s704_s1 = inlined_call_operand.vmem [shape: f32[300,50], index: 1, kind: input, shape index: {}]   ;;  %s705_s2 = inlined_call_operand.vmem [shape: f32[1,50], index: 2, kind: input, shape index: {}]   ;;  %s706_s3 = inlined_call_operand.vmem [shape: f32[50,32], index: 3, kind: input, shape index: {}]   ;;  %s707_s4 = inlined_call_operand.vmem [shape: f32[1,32], index: 4, kind: input, shape index: {}]   ;;  %s708_s5 = inlined_call_operand.hbm [shape: f32[8,32], index: 5, kind: output, shape index: {}]  }
   0x1   :  { %v40_v0 = vld [vmem:[%s704_s1 + $0x80] sm:$0xff]  ;;  %v41_v1 = vld [vmem:[%s704_s1 + $0x88] sm:$0xff]  ;;  %v42_v5 = vld [vmem:[%s704_s1 + $0x90] sm:$0xff]  ;;  %447 = vmatprep.subr.bf16.mxu1 %v495_v7  ;;  %395 = vmatprep.mubr.msk.f32.mxu1 %vm496_vm0, %v497_v13 }
   0x2   :  { %v24_v2 = vld [vmem:[%s704_s1] sm:$0xff]  ;;  %v415_v3 = vpack.c.bf16 %v41_v1, %v40_v0  ;;  %v25_v4 = vld [vmem:[%s704_s1 + $0x8] sm:$0xff]  ;;  %v43_v6 = vld [vmem:[%s704_s1 + $0x98] sm:$0xff] }
   0x3   :  { %v417_v8 = vpack.c.bf16 %v25_v4, %v24_v2  ;;  %v419_v9 = vpack.c.bf16 %v43_v6, %v42_v5  ;;  %v26_v10 = vld [vmem:[%s704_s1 + $0x10] sm:$0xff]  ;;  %v27_v11 = vld [vmem:[%s704_s1 + $0x18] sm:$0xff]  ;;  %v44_v12 = vld [vmem:[%s704_s1 + $0xa0] sm:$0xff] }
   0x4   :  { %416 = vmatprep.subr.bf16.mxu0 %v415_v3  ;;  %v45_v14 = vld [vmem:[%s704_s1 + $0xa8] sm:$0xff]  ;;  %v421_v15 = vpack.c.bf16 %v27_v11, %v26_v10  ;;  %v28_v17 = vld [vmem:[%s704_s1 + $0x20] sm:$0xff]  ;;  %v46_v19 = vld [vmem:[%s704_s1 + $0xb0] sm:$0xff] }
   0x5   :  { %418 = vmatpush3.bf16.msra.mxu0 %v417_v8  ;;  %v423_v16 = vpack.c.bf16 %v45_v14, %v44_v12  ;;  %v29_v18 = vld [vmem:[%s704_s1 + $0x28] sm:$0xff]  ;;  %v47_v20 = vld [vmem:[%s704_s1 + $0xb8] sm:$0xff]  ;;  %v30_v22 = vld [vmem:[%s704_s1 + $0x30] sm:$0xff] }
   0x6   :  { %420 = vmatprep.subr.bf16.mxu0 %v419_v9  ;;  %v425_v21 = vpack.c.bf16 %v29_v18, %v28_v17  ;;  %v427_v23 = vpack.c.bf16 %v47_v20, %v46_v19  ;;  %v31_v24 = vld [vmem:[%s704_s1 + $0x38] sm:$0xff]  ;;  %v56_v25 = vld [vmem:[%s704_s1 + $0x100] sm:$0xff]  ;;  %v57_v26 = vld [vmem:[%s704_s1 + $0x108] sm:$0xff] }
   0x7   :  { %v48_v27 = vld [vmem:[%s704_s1 + $0xc0] sm:$0xff]  ;;  %v49_v28 = vld [vmem:[%s704_s1 + $0xc8] sm:$0xff]  ;;  %v448_v29 = vpack.c.bf16 %v57_v26, %v56_v25  ;;  %v58_v30 = vld [vmem:[%s704_s1 + $0x110] sm:$0xff]  ;;  %v429_v32 = vpack.c.bf16 %v31_v24, %v30_v22 }
   0x8   :  { %v59_v31 = vld [vmem:[%s704_s1 + $0x118] sm:$0xff]  ;;  %v32_v33 = vld [vmem:[%s704_s1 + $0x40] sm:$0xff]  ;;  %v22_v35 = vld [vmem:[%s703_s0 + $0x8] sm:$0xff]  ;;  %v431_v36 = vpack.c.bf16 %v49_v28, %v48_v27 }
   0x9   :  { %422 = vmatpush3.bf16.msra.mxu0 %v421_v15  ;;  %449 = vmatpush3.bf16.msra.mxu1 %v448_v29  ;;  %v451_v34 = vpack.c.bf16 %v59_v31, %v58_v30  ;;  %v33_v37 = vld [vmem:[%s704_s1 + $0x48] sm:$0xff]  ;;  %v60_v38 = vld [vmem:[%s704_s1 + $0x120] sm:$0xff]  ;;  %v50_v40 = vld [vmem:[%s704_s1 + $0xd0] sm:$0xff] }
   0xa   :  { %424 = vmatprep.subr.bf16.mxu0 %v423_v16  ;;  %450 = vmatprep.subr.bf16.mxu1 %v495_v7  ;;  %v61_v39 = vld [vmem:[%s704_s1 + $0x128] sm:$0xf]  ;;  %v51_v41 = vld [vmem:[%s704_s1 + $0xd8] sm:$0xff] }
   0xb   :  { %141 = vmatprep.mubr.f32.mxu0 %v22_v35 }
   0xd   :  { %426 = vmatpush3.bf16.msra.mxu0 %v425_v21 }
   0xe   :  { %428 = vmatprep.subr.bf16.mxu0 %v427_v23 }
   0xf   :  { %10 = vsyncpa [#allocation3], 0  ;;  %v433_v42 = vpack.c.bf16 %v33_v37, %v32_v33  ;;  %v34_v43 = vld [vmem:[%s704_s1 + $0x50] sm:$0xff]  ;;  %v35_v44 = vld [vmem:[%s704_s1 + $0x58] sm:$0xff]  ;;  %452 = vmatpush3.bf16.msra.mxu1 %v451_v34  ;;  %v454_v45 = vpack.c.bf16 %v61_v39, %v60_v38  ;;  %v435_v46 = vpack.c.bf16 %v51_v41, %v50_v40  ;;  %vm498_vm2 = vmmov 1  }
  0x10   :  { %453 = vmatprep.subr.bf16.mxu1 %v495_v7  ;;  %vm455_vm3 = vmpackc.low %vm73_vm1, %vm498_vm2  ;;  %v218_v47 = vld [vmem:[%s706_s3] sm:$0xff]  ;;  %v219_v48 = vld [vmem:[%s706_s3 + $0x8] sm:$0xff]  ;;  %v437_v51 = vpack.c.bf16 %v35_v44, %v34_v43  ;;  %vm69_vm4 = vcmask 359424   ;;  %vm236_vm5 = vcmask 1041408   ;;  %vm232_vm6 = vcmask 408576  }
  0x11   :  { %430 = vmatpush3.bf16.msra.mxu0 %v429_v32  ;;  %v52_v49 = vld [vmem:[%s704_s1 + $0xe0] sm:$0xff]  ;;  %v53_v50 = vld [vmem:[%s704_s1 + $0xe8] sm:$0xff]  ;;  %v23_v52 = vld [vmem:[%s703_s0 + $0x10] sm:$0xff]  ;;  %v458_v53 = vpack.c.bf16 %v219_v48, %v218_v47  ;;  %vm311_vm7 = vcmask 261120  }
  0x12   :  { %432 = vmatprep.subr.bf16.mxu0 %v431_v36  ;;  %v439_v54 = vpack.c.bf16 %v53_v50, %v52_v49  ;;  %v36_v55 = vld [vmem:[%s704_s1 + $0x60] sm:$0xff]  ;;  %v37_v56 = vld [vmem:[%s704_s1 + $0x68] sm:$0xff]  ;;  %v54_v57 = vld [vmem:[%s704_s1 + $0xf0] sm:$0xff] }
  0x13   :  { %456 = vmatpush3.bf16.msk.msra.mxu1 %vm455_vm3, %v454_v45  ;;  %v55_v58 = vld [vmem:[%s704_s1 + $0xf8] sm:$0xff]  ;;  %v441_v59 = vpack.c.bf16 %v37_v56, %v36_v55  ;;  %v38_v61 = vld [vmem:[%s704_s1 + $0x70] sm:$0xff]  ;;  %v21_v0 = vld [vmem:[%s703_s0] sm:$0xff] }
  0x14   :  { %457 = vmatprep.subr.bf16.mxu1 %v495_v7  ;;  %v443_v60 = vpack.c.bf16 %v55_v58, %v54_v57  ;;  %v39_v62 = vld [vmem:[%s704_s1 + $0x78] sm:$0xff]  ;;  %v220_v1 = vld [vmem:[%s706_s3 + $0x10] sm:$0xff]  ;;  %v222_v4 = vld [vmem:[%s706_s3 + $0x20] sm:$0xff] }
  0x15   :  { %434 = vmatpush3.bf16.msra.mxu0 %v433_v42  ;;  %v445_v63 = vpack.c.bf16 %v39_v62, %v38_v61  ;;  %v221_v2 = vld [vmem:[%s706_s3 + $0x18] sm:$0xff]  ;;  %v223_v5 = vld [vmem:[%s706_s3 + $0x28] sm:$0xff]  ;;  %v224_v8 = vld [vmem:[%s706_s3 + $0x30] sm:$0x3]  ;;  %s499_s3 = smov [#allocation2]  }
  0x16   :  { %436 = vmatprep.subr.bf16.mxu0 %v435_v46  ;;  %396 = vmatmul.mubr.msk.f32.vlgmr.msra.gmra.mrb[0].mxu1 %vm69_vm4, %v23_v52  ;;  %v461_v3 = vpack.c.bf16 %v221_v2, %v220_v1  ;;  %v464_v6 = vpack.c.bf16 %v223_v5, %v222_v4  ;;  %v327_v12 = vld [vmem:[%s705_s2] ss:$0 sm:$0xff]  ;;  %s319_s16 = sshll.u32 %s499_s3, 4  ;;  %s320_s16 = int_to_ptr.vmem [resolvable:$true] %s319_s16 }
  0x17   :  { %459 = vmatpush3.bf16.msra.mxu1 %v458_v53  ;;  %412 = vmatprep.mubr.msk.f32.mxu1 %vm496_vm0, %v497_v13  ;;  %s471_s2 = scalar_lea.vmem %s320_s16, 128  ;;  %p476_p1 = scmp.lt.s32.totalorder %s320_s16, %s320_s16 }
  0x18   :  { %460 = vmatprep.subr.bf16.mxu1 %v495_v7  ;;  %p472_p0 = scmp.ne.s32.totalorder %s320_s16, %s471_s2  ;;  %p477_p2 = scmp.lt.s32.totalorder %s471_s2, %s471_s2 }
  0x19   :  { %438 = vmatpush3.bf16.msra.mxu0 %v437_v51 }
  0x1a   :  { %440 = vmatprep.subr.bf16.mxu0 %v439_v54  ;;  %p478_p3 = por %p477_p2, %p476_p1 }
  0x1b   :  { %462 = vmatpush3.bf16.msra.mxu1 %v461_v3 }
  0x1c   :  { %463 = vmatprep.subr.bf16.mxu1 %v495_v7  ;;  %p479_p4 = pnand %p478_p3, %p472_p0 }
  0x1d   :  { %442 = vmatpush3.bf16.msra.mxu0 %v441_v59 }
  0x1e   :  { %444 = vmatprep.subr.bf16.mxu0 %v443_v60 }
  0x1f   :  { %465 = vmatpush3.bf16.msra.mxu1 %v464_v6 }
  0x20   :  { %410 = vmatprep.subr.mxu1 %v497_v13  ;;  %v330_v13 = vld [vmem:[%s707_s4] ss:$0 sm:$0xff] }
  0x21   :  { %446 = vmatpush3.bf16.msra.mxu0 %v445_v63 }
  0x23   :  { %411 = vmatpush3.msk.msra.mxu1 %vm236_vm5, %v224_v8 }
  0x24   :  { %142 = vmatmul.mubr.f32.vlgmr.msra.gmra.mrb[0].mxu0 %v21_v0 }
  0xe9   :  { %v213_v9 = vpop.f32.mrb[0].mxu1 }
  0xea   :  { %v397_v7 = vpop.f32.mrb[1].mxu1 }
  0xf7   :  { %v365_v10 = vpop.f32.mrb[0].mxu0 }
  0xf8   :  { %v366_v11 = vpop.f32.mrb[1].mxu0 }
  0xf9   :  { %v367_v14 = vadd.f32 %v366_v11, %v365_v10 }
  0xfb   :  { %v144_v15 = vadd.f32 %v367_v14, %v327_v12 }
  0xfd   :  { %v214_v16 = vadd.f32 %v213_v9, %v144_v15 }
  0xff   :  { %v217_v17 = vmax.f32 %v214_v16, 0.0 }
 0x101   :  { %413 = vmatmul.mubr.msk.f32.vlgmr.msra.gmra.mrb[2].mxu1 %vm232_vm6, %v217_v17 }
 0x1d4   :  { %v306_v18 = vpop.f32.mrb[2].mxu1 }
 0x1d5   :  { %v307_v19 = vadd.f32 %v330_v13, %v306_v18  ;;  %v414_v20 = vpop.f32.mrb[3].mxu1 }
 0x1d7   :  { %v310_v21 = vmax.f32 %v307_v19, 0.0 }
 0x1d9   :  { %312 = vst.msk [vmem:[#allocation2] sm:$0xff] %vm311_vm7, %v310_v21 }
 0x1da   :  { %482 = shalt.err (!%p479_p4)
}
 0x1db   :  { %s483_s4 = scalar_lea.hbm %s708_s5, 128 }
 0x1dc   :  { %p484_p5 = scmp.ne.s32.totalorder %s708_s5, %s483_s4  ;;  %p487_p6 = scmp.lt.u32.totalorder %s483_s4, %s708_s5 }
 0x1de   :  { %p489_p7 = pnand %p487_p6, %p484_p5 }
 0x1e0   :  { %492 = shalt.err (!%p489_p7)
}
 0x1e1   :  { %322 = dma.vmem_to_hbm [thread:$0]  %s320_s16, 128, %s708_s5, [#allocation3]  }
 0x1e2   :  { %493 = dma.done.wait [#allocation3], 128  }
 0x1e3   :  { %494 = vsyncadd [#allocation3], 4294967168 }
 0x1e4   :  { %326 = vsyncpa [#allocation3], 1 }

</bundles_post_ra>
